<compile_context>
chip_gen: v6e
topology: v6e:2x2x1
jax: 0.10.0
libtpu: 0.0.40
codegen_flags: <defaults>
</compile_context>

<pallas_src>
import jax
import jax.numpy as jnp
from jax.experimental import pallas as pl
from jax.experimental.pallas import tpu as pltpu

_BETA = 100.0
_INV_BETA = 1.0 / _BETA
_THRESHOLD = 20.0


def _round_up(x: int, m: int) -> int:
    return (x + m - 1) // m * m


def _fcblock_kernel(x_ref, w_ref, b_ref, o_ref, acc_ref):
    # x_ref: (TM, TK) bf16, w_ref: (TK, TN) bf16, b_ref: (1, TN) f32,
    # o_ref: (TM, TN) f32, acc_ref: (TM, TN) f32 scratch accumulator.
    k = pl.program_id(2)

    @pl.when(k == 0)
    def _():
        acc_ref[...] = jnp.zeros_like(acc_ref)

    acc_ref[...] += jnp.dot(
        x_ref[...], w_ref[...], preferred_element_type=jnp.float32
    )

    @pl.when(k == pl.num_programs(2) - 1)
    def _():
        y = acc_ref[...] + b_ref[...]           # broadcast (1, TN) over rows
        by = _BETA * y
        # Clamp the exp argument so the non-selected branch never produces inf.
        soft = jnp.log1p(jnp.exp(jnp.minimum(by, _THRESHOLD))) * _INV_BETA
        o_ref[...] = jnp.where(by > _THRESHOLD, y, soft).astype(o_ref.dtype)


def fc_block(x, w_t, b, *, tile_m=None, tile_n=None, tile_k=None):
    """FCBlock forward.

    x:   (M, K) f32 input
    w_t: (K, N) f32 weight (transposed torch nn.Linear weight)
    b:   (N,)   f32 bias
    returns (M, N) f32 = softplus_beta100(x @ w_t + b)
    """
    M, K = x.shape
    K2, N = w_t.shape
    assert K == K2, (K, K2)
    assert b.shape == (N,), b.shape

    # ---- lane-dense padding (last dims -> multiples of 128) -----------------
    Kp = _round_up(K, 128)
    Np = _round_up(N, 128)

    if tile_n is None:
        tile_n = min(256, Np)
    if tile_k is None:
        tile_k = min(512, Kp)
    Np = _round_up(Np, tile_n)
    Kp = _round_up(Kp, tile_k)

    # ---- tile_m selection with explicit VMEM budget --------------------------
    if tile_m is None:
        tile_m = min(512, _round_up(M, 16))

    def _footprint(tm):
        return (
            2 * tm * tile_k * 2        # double-buffered bf16 x tiles
            + 2 * tile_k * tile_n * 2  # double-buffered bf16 weight tiles
            + 2 * tm * tile_n * 4      # double-buffered f32 output tiles
            + 2 * tile_n * 4           # bias
            + tm * tile_n * 4          # f32 accumulator scratch
        )

    budget = 20 * 1024 * 1024          # conservative: fits v5e/v6e/v7x
    while tile_m > 16 and _footprint(tile_m) > budget:
        tile_m //= 2
    Mp = _round_up(M, tile_m)

    # ---- pad + cast inputs (bf16 for the MXU, f32 bias) ----------------------
    xp = jnp.zeros((Mp, Kp), jnp.bfloat16).at[:M, :K].set(x.astype(jnp.bfloat16))
    wp = jnp.zeros((Kp, Np), jnp.bfloat16).at[:K, :N].set(w_t.astype(jnp.bfloat16))
    bp = jnp.zeros((1, Np), jnp.float32).at[0, :N].set(b.astype(jnp.float32))

    grid = (Mp // tile_m, Np // tile_n, Kp // tile_k)

    cost = pl.CostEstimate(
        flops=2 * Mp * Np * Kp,
        transcendentals=2 * Mp * Np,
        bytes_accessed=Mp * Kp * 2 + Kp * Np * 2 + Np * 4 + Mp * Np * 4,
    )

    out_padded = pl.pallas_call(
        _fcblock_kernel,
        out_shape=jax.ShapeDtypeStruct((Mp, Np), jnp.float32),
        grid_spec=pltpu.PrefetchScalarGridSpec(
            num_scalar_prefetch=0,
            grid=grid,
            in_specs=[
                pl.BlockSpec((tile_m, tile_k), lambda i, j, k: (i, k)),  # x
                pl.BlockSpec((tile_k, tile_n), lambda i, j, k: (k, j)),  # W^T
                pl.BlockSpec((1, tile_n), lambda i, j, k: (0, j)),       # bias
            ],
            out_specs=pl.BlockSpec((tile_m, tile_n), lambda i, j, k: (i, j)),
            scratch_shapes=[pltpu.VMEM((tile_m, tile_n), jnp.float32)],
        ),
        compiler_params=pltpu.CompilerParams(
            dimension_semantics=("parallel", "parallel", "arbitrary"),
            vmem_limit_bytes=32 * 1024 * 1024,
        ),
        cost_estimate=cost,
    )(xp, wp, bp)

    return out_padded[:M, :N].astype(x.dtype)


def _reference(x, w_t, b):
    # Same bf16 quantization of the matmul inputs as the kernel, f32 accumulate.
    y = jnp.dot(
        x.astype(jnp.bfloat16).astype(jnp.float32),
        w_t.astype(jnp.bfloat16).astype(jnp.float32),
    ) + b[None, :]
    by = _BETA * y
    soft = jnp.log1p(jnp.exp(jnp.minimum(by, _THRESHOLD))) * _INV_BETA
    return jnp.where(by > _THRESHOLD, y, soft)


if __name__ == "__main__":
    key = jax.random.PRNGKey(0)
    k_x, k_w, k_b = jax.random.split(key, 3)

    batch = 8
    in_features = 32
    out_features = 64

    # Deterministic parameter init mimicking nn.Linear's default
    # (uniform in [-1/sqrt(in_features), 1/sqrt(in_features)]).
    bound = 1.0 / (in_features ** 0.5)
    w_torch_layout = jax.random.uniform(
        k_w, (out_features, in_features), jnp.float32, minval=-bound, maxval=bound)
    bias = jax.random.uniform(
        k_b, (out_features,), jnp.float32, minval=-bound, maxval=bound)
    w_t = w_torch_layout.T  # (in_features, out_features)

    x = jax.random.normal(k_x, (batch, in_features), jnp.float32)

    out = fc_block(x, w_t, bias)
    out = jax.block_until_ready(out)

    ref = _reference(x, w_t, bias)
    assert out.shape == (batch, out_features), out.shape
    assert jnp.allclose(out, ref, atol=1e-3, rtol=1e-3), "mismatch vs reference"

    print("KERNEL_OK")
</pallas_src>

<mosaic_0001>
module attributes {stable_mosaic.version = 11 : i64} {
  func.func @_fcblock_kernel(%arg0: i32, %arg1: i32, %arg2: i32, %arg3: memref<16x128xbf16, #tpu.memory_space<vmem>>, %arg4: memref<128x128xbf16, #tpu.memory_space<vmem>>, %arg5: memref<1x128xf32, #tpu.memory_space<vmem>>, %arg6: memref<16x128xf32, #tpu.memory_space<vmem>>, %arg7: memref<16x128xf32, #tpu.memory_space<vmem>>) attributes {dimension_semantics = [#tpu.dimension_semantics<parallel>, #tpu.dimension_semantics<parallel>, #tpu.dimension_semantics<arbitrary>], iteration_bounds = array<i64: 1, 1, 1>, scalar_prefetch = 0 : i64, scratch_operands = 1 : i64, tpu.core_type = #tpu.core_type<tc>, window_params = [{transform_indices = @transform_0, window_bounds = array<i64: 16, 128>}, {transform_indices = @transform_1, window_bounds = array<i64: 128, 128>}, {transform_indices = @transform_2, window_bounds = array<i64: 1, 128>}, {transform_indices = @transform_3, window_bounds = array<i64: 16, 128>}]} {
    %c0_i32 = arith.constant 0 : i32
    %0 = arith.cmpi eq, %arg2, %c0_i32 : i32
    %1 = arith.extui %0 : i1 to i32
    %c0_i32_0 = arith.constant 0 : i32
    %2 = arith.cmpi ne, %1, %c0_i32_0 : i32
    scf.if %2 {
      %cst_10 = arith.constant 0.000000e+00 : f32
      %12 = vector.broadcast %cst_10 : f32 to vector<16x128xf32>
      %c0_11 = arith.constant 0 : index
      %c0_12 = arith.constant 0 : index
      %13 = vector.load %arg7[%c0_11, %c0_12] : memref<16x128xf32, #tpu.memory_space<vmem>>, vector<16x128xf32>
      tpu.vector_store %arg7[%c0_11, %c0_12], %12 {strides = array<i32>} : memref<16x128xf32, #tpu.memory_space<vmem>>, vector<16x128xf32>,
    } else {
    }
    %c0 = arith.constant 0 : index
    %c0_1 = arith.constant 0 : index
    %3 = vector.load %arg7[%c0, %c0_1] : memref<16x128xf32, #tpu.memory_space<vmem>>, vector<16x128xf32>
    %c0_2 = arith.constant 0 : index
    %c0_3 = arith.constant 0 : index
    %4 = vector.load %arg3[%c0_2, %c0_3] : memref<16x128xbf16, #tpu.memory_space<vmem>>, vector<16x128xbf16>
    %c0_4 = arith.constant 0 : index
    %c0_5 = arith.constant 0 : index
    %5 = vector.load %arg4[%c0_4, %c0_5] : memref<128x128xbf16, #tpu.memory_space<vmem>>, vector<128x128xbf16>
    %cst = arith.constant dense<0.000000e+00> : vector<16x128xf32>
    %6 = tpu.matmul %4, %5, %cst {dimension_numbers = #tpu.dot_dimension_numbers<[1], [0], [0], [1], [0, 0, 1, 1], [], []>} : vector<16x128xbf16>, vector<128x128xbf16>, vector<16x128xf32> -> vector<16x128xf32>
    %7 = arith.addf %3, %6 : vector<16x128xf32>
    %c0_6 = arith.constant 0 : index
    %c0_7 = arith.constant 0 : index
    %8 = vector.load %arg7[%c0_6, %c0_7] : memref<16x128xf32, #tpu.memory_space<vmem>>, vector<16x128xf32>
    tpu.vector_store %arg7[%c0_6, %c0_7], %7 {strides = array<i32>} : memref<16x128xf32, #tpu.memory_space<vmem>>, vector<16x128xf32>,
    %c0_i32_8 = arith.constant 0 : i32
    %9 = arith.cmpi eq, %arg2, %c0_i32_8 : i32
    %10 = arith.extui %9 : i1 to i32
    %c0_i32_9 = arith.constant 0 : i32
    %11 = arith.cmpi ne, %10, %c0_i32_9 : i32
    scf.if %11 {
      %c0_10 = arith.constant 0 : index
      %c0_11 = arith.constant 0 : index
      %12 = vector.load %arg7[%c0_10, %c0_11] : memref<16x128xf32, #tpu.memory_space<vmem>>, vector<16x128xf32>
      %c0_12 = arith.constant 0 : index
      %c0_13 = arith.constant 0 : index
      %13 = vector.load %arg5[%c0_12, %c0_13] : memref<1x128xf32, #tpu.memory_space<vmem>>, vector<1x128xf32>
      %14 = vector.broadcast %13 : vector<1x128xf32> to vector<16x128xf32>
      %15 = arith.addf %12, %14 : vector<16x128xf32>
      %cst_14 = arith.constant 1.000000e+02 : f32
      %16 = vector.broadcast %cst_14 : f32 to vector<16x128xf32>
      %17 = arith.mulf %16, %15 : vector<16x128xf32>
      %cst_15 = arith.constant 2.000000e+01 : f32
      %18 = vector.broadcast %cst_15 : f32 to vector<16x128xf32>
      %19 = arith.minimumf %17, %18 : vector<16x128xf32>
      %20 = math.exp %19 : vector<16x128xf32>
      %21 = math.log1p %20 : vector<16x128xf32>
      %cst_16 = arith.constant 0.00999999977 : f32
      %22 = vector.broadcast %cst_16 : f32 to vector<16x128xf32>
      %23 = arith.mulf %21, %22 : vector<16x128xf32>
      %cst_17 = arith.constant 2.000000e+01 : f32
      %24 = vector.broadcast %cst_17 : f32 to vector<16x128xf32>
      %25 = arith.cmpf ogt, %17, %24 : vector<16x128xf32>
      %26 = arith.select %25, %15, %23 : vector<16x128xi1>, vector<16x128xf32>
      %c0_18 = arith.constant 0 : index
      %c0_19 = arith.constant 0 : index
      %27 = vector.load %arg6[%c0_18, %c0_19] : memref<16x128xf32, #tpu.memory_space<vmem>>, vector<16x128xf32>
      tpu.vector_store %arg6[%c0_18, %c0_19], %26 {strides = array<i32>} : memref<16x128xf32, #tpu.memory_space<vmem>>, vector<16x128xf32>,
    } else {
    }
    return
  }
  func.func @transform_0(%arg0: i32, %arg1: i32, %arg2: i32) -> (i32, i32) {
    %c0_i32 = arith.constant 0 : i32
    return %arg0, %arg2 : i32, i32
  }
  func.func @transform_1(%arg0: i32, %arg1: i32, %arg2: i32) -> (i32, i32) {
    %c0_i32 = arith.constant 0 : i32
    return %arg2, %arg1 : i32, i32
  }
  func.func @transform_2(%arg0: i32, %arg1: i32, %arg2: i32) -> (i32, i32) {
    %c0_i32 = arith.constant 0 : i32
    %c0_i32_0 = arith.constant 0 : i32
    return %c0_i32, %arg1 : i32, i32
  }
  func.func @transform_3(%arg0: i32, %arg1: i32, %arg2: i32) -> (i32, i32) {
    %c0_i32 = arith.constant 0 : i32
    return %arg0, %arg1 : i32, i32
  }
}

</mosaic_0001>

<bundles_post_ra>
// kernel: tpu_custom_call.1
= control target key start
LH: loop header
LB: loop body
LE: loop exit
PB: predicated region body
PF: predicated region fallthrough
CT: control target
= control target key end

     0   :  { %8 = vsyncpa [#allocation4], 0  ;;  %s407_s0 = inlined_call_operand.hbm [shape: bf16[16,128], index: 0, kind: input, shape index: {}]   ;;  %s408_s1 = inlined_call_operand.hbm [shape: bf16[128,128], index: 1, kind: input, shape index: {}]   ;;  %s409_s2 = inlined_call_operand.vmem [shape: f32[1,128], index: 2, kind: input, shape index: {}]   ;;  %s410_s3 = inlined_call_operand.hbm [shape: f32[16,128], index: 3, kind: output, shape index: {}]  }
   0x1   :  { %9 = vsyncpa [#allocation7], 0 }
   0x2   :  { %10 = vsyncpa [#allocation5], 0  ;;  %s366_s12 = smov [#allocation3]  }
   0x3   :  { %s16_s13 = sshll.u32 %s366_s12, 4  ;;  %s17_s13 = int_to_ptr.vmem [resolvable:$true] %s16_s13 }
   0x4   :  { %s308_s14 = scalar_lea.vmem %s17_s13, 128  ;;  %p313_p1 = scmp.lt.s32.totalorder %s17_s13, %s17_s13 }
   0x5   :  { %p309_p0 = scmp.ne.s32.totalorder %s17_s13, %s308_s14  ;;  %p314_p2 = scmp.lt.s32.totalorder %s308_s14, %s308_s14 }
   0x7   :  { %p315_p3 = por %p314_p2, %p313_p1 }
   0x9   :  { %p316_p4 = pnand %p315_p3, %p309_p0 }
   0xb   :  { %319 = shalt.err (!%p316_p4)
}
   0xc   :  { %s367_s15 = smov 64   ;;  %s368_s16 = smov 4  }
   0xd   :  { %22 = dma.hbm_to_vmem [thread:$0]  %s407_s0, 128, %s17_s13, [#allocation4], %s367_s15, %s367_s15, %s368_s16  }
   0xe   :  { %s369_s19 = smov [#allocation6]  }
   0xf   :  { %s28_s20 = sshll.u32 %s369_s19, 4  ;;  %s29_s20 = int_to_ptr.vmem [resolvable:$true] %s28_s20 }
  0x10   :  { %s328_s21 = scalar_lea.vmem %s29_s20, 1024  ;;  %p333_p6 = scmp.lt.s32.totalorder %s29_s20, %s29_s20 }
  0x11   :  { %p329_p5 = scmp.ne.s32.totalorder %s29_s20, %s328_s21  ;;  %p334_p7 = scmp.lt.s32.totalorder %s328_s21, %s328_s21 }
  0x13   :  { %p335_p8 = por %p334_p7, %p333_p6 }
  0x15   :  { %p336_p9 = pnand %p335_p8, %p329_p5 }
  0x17   :  { %339 = shalt.err (!%p336_p9)
}
  0x18   :  { %34 = dma.hbm_to_vmem [thread:$0]  %s408_s1, 1024, %s29_s20, [#allocation7], %s367_s15, %s367_s15, %s368_s16  }
  0x19   :  { %360 = dma.done.wait [#allocation4], 128  }
  0x1a   :  { %361 = vsyncadd [#allocation4], 4294967168 }
  0x1b   :  { %362 = dma.done.wait [#allocation7], 1024  }
  0x1c   :  { %363 = vsyncadd [#allocation7], 4294966272  ;;  %v370_v0 = vmov 0.0   ;;  %vm371_vm0 = vmmov 0   ;;  %v283_v1 = vld [vmem:[#allocation6 + $0x38] sm:$0xff]   ;;  %v284_v2 = vld [vmem:[#allocation6 + $0x30] sm:$0xff]  }
  0x1d   :  { %254 = vmatprep.subr.bf16.mxu0 %v370_v0  ;;  %270 = vmatprep.mubr.msk.bf16.mxu0 %vm371_vm0, %v370_v0  ;;  %v285_v3 = vld [vmem:[#allocation6 + $0x28] sm:$0xff]   ;;  %v286_v4 = vld [vmem:[#allocation6 + $0x20] sm:$0xff]   ;;  %v287_v5 = vld [vmem:[#allocation6 + $0x18] sm:$0xff]  }
  0x1e   :  { %255 = vmatpush3.bf16.msra.mxu0 %v283_v1  ;;  %v288_v6 = vld [vmem:[#allocation6 + $0x10] sm:$0xff]   ;;  %v289_v7 = vld [vmem:[#allocation6 + $0x8] sm:$0xff]   ;;  %v290_v8 = vld [vmem:[#allocation6] sm:$0xff]  }
  0x1f   :  { %256 = vmatprep.subr.bf16.mxu0 %v370_v0  ;;  %v291_v9 = vld [vmem:[#allocation3] sm:$0xff]  }
  0x20   :  { %v244_v10 = vld [vmem:[%s409_s2] ss:$0 sm:$0xff]  ;;  %s372_s2 = smov [#allocation8]  }
  0x21   :  { %s222_s24 = sshll.u32 %s372_s2, 4  ;;  %s223_s24 = int_to_ptr.vmem [resolvable:$true] %s222_s24 }
  0x22   :  { %257 = vmatpush3.bf16.msra.mxu0 %v284_v2  ;;  %s340_s25 = scalar_lea.vmem %s223_s24, 256  ;;  %p345_p11 = scmp.lt.s32.totalorder %s223_s24, %s223_s24 }
  0x23   :  { %258 = vmatprep.subr.bf16.mxu0 %v370_v0  ;;  %p341_p10 = scmp.ne.s32.totalorder %s223_s24, %s340_s25  ;;  %p346_p12 = scmp.lt.s32.totalorder %s340_s25, %s340_s25 }
  0x25   :  { %p347_p13 = por %p346_p12, %p345_p11 }
  0x26   :  { %259 = vmatpush3.bf16.msra.mxu0 %v285_v3 }
  0x27   :  { %260 = vmatprep.subr.bf16.mxu0 %v370_v0  ;;  %p348_p0 = pnand %p347_p13, %p341_p10 }
  0x2a   :  { %261 = vmatpush3.bf16.msra.mxu0 %v286_v4 }
  0x2b   :  { %262 = vmatprep.subr.bf16.mxu0 %v370_v0 }
  0x2e   :  { %263 = vmatpush3.bf16.msra.mxu0 %v287_v5 }
  0x2f   :  { %264 = vmatprep.subr.bf16.mxu0 %v370_v0 }
  0x32   :  { %265 = vmatpush3.bf16.msra.mxu0 %v288_v6 }
  0x33   :  { %266 = vmatprep.subr.bf16.mxu0 %v370_v0 }
  0x36   :  { %267 = vmatpush3.bf16.msra.mxu0 %v289_v7 }
  0x37   :  { %268 = vmatprep.subr.bf16.mxu0 %v370_v0 }
  0x3a   :  { %269 = vmatpush3.bf16.msra.mxu0 %v290_v8 }
  0x3d   :  { %271 = vmatmul.mubr.bf16.vlgmr.msra.gmra.mxu0 %v291_v9 }
  0xfd   :  { %v158_v11 = vpop.f32.mrf.mxu0 }
  0xfe   :  { %v181_v12 = vadd.f32 %v244_v10, %v158_v11 }
  0xff   :  { %v272_v13 = vpop.f32.mrf.mxu0 }
 0x100   :  { %v183_v14 = vmul.f32 100.0, %v181_v12 }
 0x101   :  { %v161_v15 = vpop.f32.mrf.mxu0 }
 0x102   :  { %v185_v16 = vmin.f32 %v183_v14, 20.0  ;;  %v182_v17 = vadd.f32 %v244_v10, %v161_v15  ;;  %vm211_vm2 = vcmp.gt.f32.partialorder %v183_v14, 20.0 }
 0x103   :  { %v273_v18 = vpop.f32.mrf.mxu0 }
 0x104   :  { %v187_v19 = vmul.f32 1.442695, %v185_v16  ;;  %v184_v20 = vmul.f32 100.0, %v182_v17 }
 0x106   :  { %292 = vpow2.f32 %v187_v19  ;;  %v186_v21 = vmin.f32 %v184_v20, 20.0  ;;  %vm212_vm4 = vcmp.gt.f32.partialorder %v184_v20, 20.0 }
 0x108   :  { %v189_v22 = vmul.f32 1.442695, %v186_v21 }
 0x10a   :  { %294 = vpow2.f32 %v189_v22 }
 0x113   :  { %v293_v23 = vpop.eup %292 }
 0x114   :  { %v191_v24 = vadd.f32 1.0, %v293_v23  ;;  %v194_v27 = vmul.f32 -0.5, %v293_v23  ;;  %v197_v30 = vand.u32 2147483647, %v293_v23 }
 0x116   :  { %296 = vlog2.f32 %v191_v24  ;;  %v195_v28 = vadd.f32 1.0, %v194_v27  ;;  %vm198_vm1 = vcmp.lt.f32.partialorder %v197_v30, 0.0004427343 }
 0x117   :  { %v295_v25 = vpop.eup %294 }
 0x118   :  { %v200_v26 = vadd.f32 1.0, %v295_v25  ;;  %v203_v29 = vmul.f32 -0.5, %v295_v25  ;;  %v196_v33 = vmul.f32 %v293_v23, %v195_v28  ;;  %v206_v35 = vand.u32 2147483647, %v295_v25 }
 0x11a   :  { %298 = vlog2.f32 %v200_v26  ;;  %v204_v34 = vadd.f32 1.0, %v203_v29  ;;  %vm207_vm3 = vcmp.lt.f32.partialorder %v206_v35, 0.0004427343 }
 0x11c   :  { %v205_v40 = vmul.f32 %v295_v25, %v204_v34 }
 0x123   :  { %v297_v31 = vpop.eup %296 }
 0x124   :  { %v193_v32 = vmul.f32 0.6931472, %v297_v31 }
 0x126   :  { %v199_v36 = vsel %vm198_vm1, %v196_v33, %v193_v32 }
 0x127   :  { %v299_v37 = vpop.eup %298  ;;  %v209_v38 = vmul.f32 0.01, %v199_v36 }
 0x128   :  { %v202_v39 = vmul.f32 0.6931472, %v299_v37 }
 0x129   :  { %v213_v41 = vsel %vm211_vm2, %v181_v12, %v209_v38 }
 0x12a   :  { %215 = vst [vmem:[#allocation8] sm:$0xff] %v213_v41  ;;  %v208_v42 = vsel %vm207_vm3, %v205_v40, %v202_v39 }
 0x12b   :  { %v210_v43 = vmul.f32 0.01, %v208_v42 }
 0x12d   :  { %v214_v44 = vsel %vm212_vm4, %v182_v17, %v210_v43 }
 0x12e   :  { %216 = vst [vmem:[#allocation8 + $0x8] sm:$0xff] %v214_v44 }
 0x12f   :  { %351 = shalt.err (!%p348_p0)
}
 0x130   :  { %s373_s26 = smov 128   ;;  %s374_s27 = smov 8  }
 0x131   :  { %228 = dma.vmem_to_hbm [thread:$0]  %s223_s24, 256, %s410_s3, [#allocation5], %s373_s26, %s373_s26, %s374_s27  }
 0x132   :  { %364 = dma.done.wait [#allocation5], 256  }
 0x133   :  { %365 = vsyncadd [#allocation5], 4294967040 }
 0x134   :  { %232 = vsyncpa [#allocation4], 1 }
 0x135   :  { %233 = vsyncpa [#allocation7], 1 }
 0x136   :  { %234 = vsyncpa [#allocation5], 1 }

</bundles_post_ra>
